<compile_context>
chip_gen: v7x
topology: tpu7x:2x2x1
jax: 0.10.0
libtpu: 0.0.40
codegen_flags: <defaults>
</compile_context>

<pallas_src>
import math

import jax
import jax.numpy as jnp
from jax.experimental import pallas as pl
from jax.experimental.pallas import tpu as pltpu


def _round_up(x, m):
    return ((x + m - 1) // m) * m


def fused_linear_kernel_single_k(x_ref, wt_ref, b_ref, o_ref):
    """o = x @ Wt + b for one (tm, tn) tile, whole K resident (no scratch).

    x:  (tm, tk)  compute dtype (bf16)
    Wt: (tk, tn)  compute dtype (bf16)
    b:  (1,  tn)  float32
    o:  (tm, tn)  float32
    """
    o_ref[...] = (
        jnp.dot(x_ref[...], wt_ref[...], preferred_element_type=jnp.float32)
        + b_ref[...]
    ).astype(o_ref.dtype)


def fused_linear_kernel_multi_k(x_ref, wt_ref, b_ref, o_ref, acc_ref):
    """One (tm, tn) output tile of  o = x @ Wt + b, accumulated over K tiles."""
    k = pl.program_id(2)

    @pl.when(k == 0)
    def _init():
        acc_ref[...] = jnp.zeros_like(acc_ref)

    acc_ref[...] += jnp.dot(
        x_ref[...], wt_ref[...], preferred_element_type=jnp.float32
    )

    @pl.when(k == pl.num_programs(2) - 1)
    def _finalize():
        # Bias add only once, off the per-K critical path.
        o_ref[...] = (acc_ref[...] + b_ref[...]).astype(o_ref.dtype)


def nparam_fc_forward(x, wt_fused, b_fused, head_sizes, *,
                      compute_dtype=jnp.bfloat16,
                      tm_max=256, tn_max=512, tk_max=512):
    """Run the fused, tiled Pallas GEMM and split outputs per head.

    Args:
      x:          (B, F) input, float32.
      wt_fused:   (F, total_out) fused transposed weights, float32.
      b_fused:    (1, total_out) fused biases, float32.
      head_sizes: list of (name, n_out) in fusion order; first entry is the
                  classifier ("__sign__", num_class).
      compute_dtype: dtype streamed into the MXU (bf16 by default; f32 acc).
    Returns:
      (x_sign, x_params_dict) exactly like the PyTorch module.
    """
    B, F = x.shape
    O = wt_fused.shape[1]

    # bf16 packs 16 rows/vreg, f32 packs 8.
    sublane = 16 if compute_dtype == jnp.bfloat16 else 8
    tm = min(_round_up(B, sublane), tm_max)
    tn = min(_round_up(O, 128), tn_max)   # lane-dense output tiles
    tk = min(_round_up(F, 128), tk_max)   # lane-dense contraction tiles

    B_pad = _round_up(B, tm)
    O_pad = _round_up(O, tn)
    F_pad = _round_up(F, tk)

    # Zero padding: extra K rows contribute 0 to the dot; extra N columns and
    # extra M rows are sliced off below.
    x_p = jnp.pad(x, ((0, B_pad - B), (0, F_pad - F))).astype(compute_dtype)
    wt_p = jnp.pad(wt_fused, ((0, F_pad - F), (0, O_pad - O))).astype(compute_dtype)
    b_p = jnp.pad(b_fused, ((0, 0), (0, O_pad - O))).astype(jnp.float32)

    m_tiles = B_pad // tm
    n_tiles = O_pad // tn
    k_tiles = F_pad // tk

    cost = pl.CostEstimate(
        flops=2 * B_pad * F_pad * O_pad,
        transcendentals=0,
        bytes_accessed=(x_p.size * x_p.dtype.itemsize
                        + wt_p.size * wt_p.dtype.itemsize
                        + b_p.size * 4
                        + B_pad * O_pad * 4),
    )

    if k_tiles == 1:
        # Fast path: whole contraction fits in one tile -> no accumulator
        # scratch, no init/finalize branching, 2-D grid fully parallel.
        out = pl.pallas_call(
            fused_linear_kernel_single_k,
            out_shape=jax.ShapeDtypeStruct((B_pad, O_pad), jnp.float32),
            grid_spec=pltpu.PrefetchScalarGridSpec(
                num_scalar_prefetch=0,
                grid=(m_tiles, n_tiles),
                in_specs=[
                    pl.BlockSpec((tm, tk), lambda i, j: (i, 0)),   # x tile
                    pl.BlockSpec((tk, tn), lambda i, j: (0, j)),   # Wt tile
                    pl.BlockSpec((1, tn), lambda i, j: (0, j)),    # bias tile
                ],
                out_specs=pl.BlockSpec((tm, tn), lambda i, j: (i, j)),
            ),
            compiler_params=pltpu.CompilerParams(
                dimension_semantics=("parallel", "parallel"),
            ),
            cost_estimate=cost,
        )(x_p, wt_p, b_p)
    else:
        out = pl.pallas_call(
            fused_linear_kernel_multi_k,
            out_shape=jax.ShapeDtypeStruct((B_pad, O_pad), jnp.float32),
            grid_spec=pltpu.PrefetchScalarGridSpec(
                num_scalar_prefetch=0,
                grid=(m_tiles, n_tiles, k_tiles),
                in_specs=[
                    pl.BlockSpec((tm, tk), lambda i, j, k: (i, k)),   # x tile
                    pl.BlockSpec((tk, tn), lambda i, j, k: (k, j)),   # Wt tile
                    pl.BlockSpec((1, tn), lambda i, j, k: (0, j)),    # bias tile
                ],
                out_specs=pl.BlockSpec((tm, tn), lambda i, j, k: (i, j)),
                scratch_shapes=[pltpu.VMEM((tm, tn), jnp.float32)],
            ),
            compiler_params=pltpu.CompilerParams(
                dimension_semantics=("parallel", "parallel", "arbitrary"),
            ),
            cost_estimate=cost,
        )(x_p, wt_p, b_p)

    # Glue: drop padding, split the fused output back into per-head tensors.
    out = out[:B, :O].astype(x.dtype)
    results = {}
    off = 0
    for name, n in head_sizes:
        results[name] = out[:, off:off + n]
        off += n
    x_sign = results.pop("__sign__")
    return x_sign, results


def init_nparam_fc(key, n_features, num_class, params):
    """Deterministic parameter init matching NParamFC.__init__ shapes.

    classifier.weight ~ N(0, sqrt(2/num_class)), shape (num_class, n_features)
    param_clfs[p].weight ~ N(0, sqrt(2/n)),       shape (n, n_features)
    biases use PyTorch's default Linear init: U(-1/sqrt(F), 1/sqrt(F)).
    Weights are stored transposed (F, out) and fused along the output axis.
    """
    heads = [("__sign__", num_class)] + list(params.items())
    wts, bs = [], []
    bound = 1.0 / math.sqrt(n_features)
    for name, n in heads:
        key, kw, kb = jax.random.split(key, 3)
        w = jax.random.normal(kw, (n, n_features), jnp.float32) * math.sqrt(2.0 / n)
        b = jax.random.uniform(kb, (n,), jnp.float32, -bound, bound)
        wts.append(w.T)          # (F, n)
        bs.append(b)
    wt_fused = jnp.concatenate(wts, axis=1)              # (F, total_out)
    b_fused = jnp.concatenate(bs, axis=0)[None, :]       # (1, total_out)
    return wt_fused, b_fused, heads


if __name__ == "__main__":
    # Small shapes consistent with the module's forward: x is (batch, n_features).
    batch = 8
    n_features = 32
    num_class = 10
    params = {"handshape": 6, "orientation": 4, "location": 12}

    key = jax.random.PRNGKey(0)
    key, kx = jax.random.split(key)
    x = jax.random.normal(kx, (batch, n_features), jnp.float32)

    wt_fused, b_fused, heads = init_nparam_fc(key, n_features, num_class, params)

    x_sign, x_params = nparam_fc_forward(x, wt_fused, b_fused, heads)
    jax.block_until_ready(x_sign)
    for v in x_params.values():
        jax.block_until_ready(v)

    # Reference check in plain JAX f32 (kernel streams bf16 with f32 accum,
    # so use a tolerance appropriate for bf16 inputs).
    atol = rtol = 5e-2
    ref_sign = x @ wt_fused[:, :num_class] + b_fused[:, :num_class]
    assert x_sign.shape == (batch, num_class)
    assert jnp.allclose(x_sign, ref_sign, atol=atol, rtol=rtol), "classifier mismatch"
    off = num_class
    for name, n in heads[1:]:
        ref = x @ wt_fused[:, off:off + n] + b_fused[:, off:off + n]
        assert x_params[name].shape == (batch, n)
        assert jnp.allclose(x_params[name], ref, atol=atol, rtol=rtol), f"{name} mismatch"
        off += n

    print("KERNEL_OK")
</pallas_src>

<mosaic_0001>
module attributes {stable_mosaic.version = 11 : i64} {
  func.func @fused_linear_kernel_single_k(%arg0: i32, %arg1: i32, %arg2: memref<16x128xbf16, #tpu.memory_space<vmem>>, %arg3: memref<128x128xbf16, #tpu.memory_space<vmem>>, %arg4: memref<1x128xf32, #tpu.memory_space<vmem>>, %arg5: memref<16x128xf32, #tpu.memory_space<vmem>>) attributes {dimension_semantics = [#tpu.dimension_semantics<parallel>, #tpu.dimension_semantics<parallel>], iteration_bounds = array<i64: 1, 1>, scalar_prefetch = 0 : i64, scratch_operands = 0 : i64, tpu.core_type = #tpu.core_type<tc>, window_params = [{transform_indices = @transform_0, window_bounds = array<i64: 16, 128>}, {transform_indices = @transform_1, window_bounds = array<i64: 128, 128>}, {transform_indices = @transform_2, window_bounds = array<i64: 1, 128>}, {transform_indices = @transform_3, window_bounds = array<i64: 16, 128>}]} {
    %c0 = arith.constant 0 : index
    %c0_0 = arith.constant 0 : index
    %0 = vector.load %arg2[%c0, %c0_0] : memref<16x128xbf16, #tpu.memory_space<vmem>>, vector<16x128xbf16>
    %c0_1 = arith.constant 0 : index
    %c0_2 = arith.constant 0 : index
    %1 = vector.load %arg3[%c0_1, %c0_2] : memref<128x128xbf16, #tpu.memory_space<vmem>>, vector<128x128xbf16>
    %cst = arith.constant dense<0.000000e+00> : vector<16x128xf32>
    %2 = tpu.matmul %0, %1, %cst {dimension_numbers = #tpu.dot_dimension_numbers<[1], [0], [0], [1], [0, 0, 1, 1], [], []>} : vector<16x128xbf16>, vector<128x128xbf16>, vector<16x128xf32> -> vector<16x128xf32>
    %c0_3 = arith.constant 0 : index
    %c0_4 = arith.constant 0 : index
    %3 = vector.load %arg4[%c0_3, %c0_4] : memref<1x128xf32, #tpu.memory_space<vmem>>, vector<1x128xf32>
    %4 = vector.broadcast %3 : vector<1x128xf32> to vector<16x128xf32>
    %5 = arith.addf %2, %4 : vector<16x128xf32>
    %c0_5 = arith.constant 0 : index
    %c0_6 = arith.constant 0 : index
    %6 = vector.load %arg5[%c0_5, %c0_6] : memref<16x128xf32, #tpu.memory_space<vmem>>, vector<16x128xf32>
    tpu.vector_store %arg5[%c0_5, %c0_6], %5 {strides = array<i32>} : memref<16x128xf32, #tpu.memory_space<vmem>>, vector<16x128xf32>,
    return
  }
  func.func @transform_0(%arg0: i32, %arg1: i32) -> (i32, i32) {
    %c0_i32 = arith.constant 0 : i32
    %c0_i32_0 = arith.constant 0 : i32
    return %arg0, %c0_i32 : i32, i32
  }
  func.func @transform_1(%arg0: i32, %arg1: i32) -> (i32, i32) {
    %c0_i32 = arith.constant 0 : i32
    %c0_i32_0 = arith.constant 0 : i32
    return %c0_i32, %arg1 : i32, i32
  }
  func.func @transform_2(%arg0: i32, %arg1: i32) -> (i32, i32) {
    %c0_i32 = arith.constant 0 : i32
    %c0_i32_0 = arith.constant 0 : i32
    return %c0_i32, %arg1 : i32, i32
  }
  func.func @transform_3(%arg0: i32, %arg1: i32) -> (i32, i32) {
    %c0_i32 = arith.constant 0 : i32
    return %arg0, %arg1 : i32, i32
  }
}

</mosaic_0001>

<bundles_post_ra>
// kernel: tpu_custom_call.1
= control target key start
LH: loop header
LB: loop body
LE: loop exit
PB: predicated region body
PF: predicated region fallthrough
CT: control target
= control target key end

     0   :  { %8 = vsyncpa [#allocation3], 0  ;;  %s381_s0 = inlined_call_operand.hbm [shape: bf16[16,128], index: 0, kind: input, shape index: {}]   ;;  %s382_s1 = inlined_call_operand.hbm [shape: bf16[128,128], index: 1, kind: input, shape index: {}]   ;;  %s383_s2 = inlined_call_operand.vmem [shape: f32[1,128], index: 2, kind: input, shape index: {}]   ;;  %s384_s3 = inlined_call_operand.hbm [shape: f32[16,128], index: 3, kind: output, shape index: {}]  }
   0x1   :  { %9 = vsyncpa [#allocation6], 0 }
   0x2   :  { %10 = vsyncpa [#allocation4], 0  ;;  %s313_s12 = smov [#allocation2]   ;;  %s241_s16 = scalar_lea.hbm %s381_s0, 128 }
   0x3   :  { %s16_s13 = sshll.u32 %s313_s12, 4  ;;  %p242_p0 = scmp.ne.s32.totalorder %s381_s0, %s241_s16  ;;  %s17_s13 = int_to_ptr.vmem [resolvable:$true] %s16_s13 }
   0x4   :  { %p245_p1 = scmp.lt.u32.totalorder %s241_s16, %s381_s0 }
   0x6   :  { %p247_p2 = pnand %p245_p1, %p242_p0 }
   0x8   :  { %250 = shalt.err (!%p247_p2)
}
   0x9   :  { %s251_s21 = scalar_lea.vmem %s17_s13, 128  ;;  %p256_p4 = scmp.lt.s32.totalorder %s17_s13, %s17_s13 }
   0xa   :  { %p252_p3 = scmp.ne.s32.totalorder %s17_s13, %s251_s21  ;;  %p257_p5 = scmp.lt.s32.totalorder %s251_s21, %s251_s21 }
   0xc   :  { %p258_p6 = por %p257_p5, %p256_p4 }
   0xe   :  { %p259_p7 = pnand %p258_p6, %p252_p3 }
  0x10   :  { %262 = shalt.err (!%p259_p7)
}
  0x11   :  { %s314_s22 = smov 64   ;;  %s315_s23 = smov 4  }
  0x12   :  { %22 = dma.hbm_to_vmem [thread:$0]  %s381_s0, 128, %s17_s13, [#allocation3], %s314_s22, %s314_s22, %s315_s23  }
  0x13   :  { %s316_s26 = smov [#allocation5]   ;;  %s263_s30 = scalar_lea.hbm %s382_s1, 1024 }
  0x14   :  { %s28_s27 = sshll.u32 %s316_s26, 4  ;;  %p264_p8 = scmp.ne.s32.totalorder %s382_s1, %s263_s30  ;;  %s29_s27 = int_to_ptr.vmem [resolvable:$true] %s28_s27 }
  0x15   :  { %p267_p9 = scmp.lt.u32.totalorder %s263_s30, %s382_s1 }
  0x17   :  { %p269_p10 = pnand %p267_p9, %p264_p8 }
  0x19   :  { %272 = shalt.err (!%p269_p10)
}
  0x1a   :  { %s273_s8 = scalar_lea.vmem %s29_s27, 1024  ;;  %p278_p12 = scmp.lt.s32.totalorder %s29_s27, %s29_s27 }
  0x1b   :  { %p274_p11 = scmp.ne.s32.totalorder %s29_s27, %s273_s8  ;;  %p279_p13 = scmp.lt.s32.totalorder %s273_s8, %s273_s8 }
  0x1d   :  { %p280_p0 = por %p279_p13, %p278_p12 }
  0x1f   :  { %p281_p1 = pnand %p280_p0, %p274_p11 }
  0x21   :  { %284 = shalt.err (!%p281_p1)
}
  0x22   :  { %34 = dma.hbm_to_vmem [thread:$0]  %s382_s1, 1024, %s29_s27, [#allocation6], %s314_s22, %s314_s22, %s315_s23  }
  0x23   :  { %307 = dma.done.wait [#allocation3], 128  }
  0x24   :  { %308 = vsyncadd [#allocation3], 4294967168 }
  0x25   :  { %309 = dma.done.wait [#allocation6], 1024  }
  0x26   :  { %310 = vsyncadd [#allocation6], 4294966272  ;;  %v317_v0 = vmov 0.0   ;;  %vm318_vm0 = vmmov 0   ;;  %v232_v1 = vld [vmem:[#allocation5] sm:$0xff]   ;;  %v233_v2 = vld [vmem:[#allocation5 + $0x8] sm:$0xff]  }
  0x27   :  { %203 = vmatprep.subr.bf16.mxu0 %v317_v0  ;;  %219 = vmatprep.mubr.msk.bf16.mxu0 %vm318_vm0, %v317_v0  ;;  %v234_v3 = vld [vmem:[#allocation5 + $0x10] sm:$0xff]   ;;  %v235_v4 = vld [vmem:[#allocation5 + $0x18] sm:$0xff]   ;;  %v236_v5 = vld [vmem:[#allocation5 + $0x20] sm:$0xff]   ;;  %s319_s11 = smov [#allocation7]  }
  0x28   :  { %204 = vmatpush3.bf16.msra.mxu0 %v232_v1  ;;  %v237_v6 = vld [vmem:[#allocation5 + $0x28] sm:$0xff]   ;;  %v238_v7 = vld [vmem:[#allocation5 + $0x30] sm:$0xff]   ;;  %v239_v8 = vld [vmem:[#allocation5 + $0x38] sm:$0xff]   ;;  %s171_s12 = sshll.u32 %s319_s11, 4  ;;  %s172_s12 = int_to_ptr.vmem [resolvable:$true] %s171_s12 }
  0x29   :  { %205 = vmatprep.subr.bf16.mxu0 %v317_v0  ;;  %v240_v9 = vld [vmem:[#allocation2] sm:$0xff]   ;;  %s285_s13 = scalar_lea.vmem %s172_s12, 256  ;;  %p290_p3 = scmp.lt.s32.totalorder %s172_s12, %s172_s12 }
  0x2a   :  { %v184_v10 = vld [vmem:[%s383_s2] ss:$0 sm:$0xff]  ;;  %p286_p2 = scmp.ne.s32.totalorder %s172_s12, %s285_s13  ;;  %p291_p4 = scmp.lt.s32.totalorder %s285_s13, %s285_s13 }
  0x2c   :  { %206 = vmatpush3.bf16.msra.mxu0 %v233_v2  ;;  %p292_p5 = por %p291_p4, %p290_p3 }
  0x2d   :  { %207 = vmatprep.subr.bf16.mxu0 %v317_v0 }
  0x2e   :  { %p293_p6 = pnand %p292_p5, %p286_p2 }
  0x30   :  { %208 = vmatpush3.bf16.msra.mxu0 %v234_v3 }
  0x31   :  { %209 = vmatprep.subr.bf16.mxu0 %v317_v0 }
  0x34   :  { %210 = vmatpush3.bf16.msra.mxu0 %v235_v4 }
  0x35   :  { %211 = vmatprep.subr.bf16.mxu0 %v317_v0 }
  0x38   :  { %212 = vmatpush3.bf16.msra.mxu0 %v236_v5 }
  0x39   :  { %213 = vmatprep.subr.bf16.mxu0 %v317_v0 }
  0x3c   :  { %214 = vmatpush3.bf16.msra.mxu0 %v237_v6 }
  0x3d   :  { %215 = vmatprep.subr.bf16.mxu0 %v317_v0 }
  0x40   :  { %216 = vmatpush3.bf16.msra.mxu0 %v238_v7 }
  0x41   :  { %217 = vmatprep.subr.bf16.mxu0 %v317_v0 }
  0x44   :  { %218 = vmatpush3.bf16.msra.mxu0 %v239_v8 }
  0x47   :  { %220 = vmatmul.mubr.bf16.vlgmr.msra.gmra.mrb[0].mxu0 %v240_v9 }
 0x11a   :  { %v157_v11 = vpop.f32.mrb[0].mxu0 }
 0x11b   :  { %v158_v12 = vadd.f32 %v184_v10, %v157_v11  ;;  %v221_v13 = vpop.f32.mrb[1].mxu0 }
 0x11c   :  { %v160_v14 = vpop.f32.mrb[2].mxu0 }
 0x11d   :  { %164 = vst [vmem:[#allocation7] sm:$0xff] %v158_v12  ;;  %v161_v15 = vadd.f32 %v184_v10, %v160_v14  ;;  %v222_v16 = vpop.f32.mrb[3].mxu0 }
 0x11f   :  { %165 = vst [vmem:[#allocation7 + $0x8] sm:$0xff] %v161_v15 }
 0x120   :  { %296 = shalt.err (!%p293_p6)
}
 0x121   :  { %s297_s15 = scalar_lea.hbm %s384_s3, 256 }
 0x122   :  { %p298_p7 = scmp.ne.s32.totalorder %s384_s3, %s297_s15  ;;  %p301_p8 = scmp.lt.u32.totalorder %s297_s15, %s384_s3 }
 0x124   :  { %p303_p9 = pnand %p301_p8, %p298_p7 }
 0x126   :  { %306 = shalt.err (!%p303_p9)
}
 0x127   :  { %s320_s20 = smov 128   ;;  %s321_s21 = smov 8  }
 0x128   :  { %177 = dma.vmem_to_hbm [thread:$0]  %s172_s12, 256, %s384_s3, [#allocation4], %s320_s20, %s320_s20, %s321_s21  }
 0x129   :  { %311 = dma.done.wait [#allocation4], 256  }
 0x12a   :  { %312 = vsyncadd [#allocation4], 4294967040 }
 0x12b   :  { %181 = vsyncpa [#allocation3], 1 }
 0x12c   :  { %182 = vsyncpa [#allocation6], 1 }
 0x12d   :  { %183 = vsyncpa [#allocation4], 1 }

</bundles_post_ra>
